<compile_context>
chip_gen: v5e
topology: v5e:2x2
jax: 0.10.0
libtpu: 0.0.40
codegen_flags: <defaults>
</compile_context>

<pallas_src>
import jax
import jax.numpy as jnp
from jax import lax
from jax.experimental import pallas as pl
from jax.experimental.pallas import tpu as pltpu

LANE = 128  # TPU lane width


def _actor_kernel(x_ref, w1_ref, w2_ref, w3c_ref, b1_ref, b2_ref, b3_ref, o_ref):
    # x_ref  : [TB, S]   natural layout input tile (compute dtype)
    # w1_ref : [H1, S]   (compute dtype)
    # w2_ref : [H2, H1]  (compute dtype)
    # w3c_ref: [H2, 1]   f32 column of the final Linear (VPU path)
    # b1/b2/b3: [H1,1] / [H2,1] / [1,1]  f32 biases (VPU broadcast-adds)
    # o_ref  : [1, TB]   lane-dense, unmasked store
    x = x_ref[...]

    # Layer 1: contract on S (last dim of both operands) -> [H1, TB].
    # f32 MXU accumulation; the rhs "transpose" rides the MXU/XLU, no copy.
    h1 = lax.dot_general(
        w1_ref[...], x, (((1,), (1,)), ((), ())),
        preferred_element_type=jnp.float32)
    h1 = jnp.maximum(h1 + b1_ref[...], 0.0)          # f32 bias add + ReLU (VPU)

    # Layer 2: [H2, H1] @ [H1, TB] -> [H2, TB]; operands cast to compute dtype.
    h2 = jnp.dot(w2_ref[...], h1.astype(w2_ref.dtype),
                 preferred_element_type=jnp.float32)
    h2 = jnp.maximum(h2 + b2_ref[...], 0.0)

    # Layer 3 (out = 1): broadcast multiply + sublane reduce (VPU + XLU),
    # avoiding an M=1 MXU pass with 1/256 output-row utilization.
    logit = jnp.sum(w3c_ref[...] * h2, axis=0, keepdims=True) + b3_ref[...]

    o_ref[...] = jax.nn.sigmoid(logit).astype(o_ref.dtype)   # f32 EUP sigmoid


def ap_actor_forward(state, params, *, tile_b=2048, compute_dtype=jnp.bfloat16):
    """state: [B, S] float32 -> [B, 1] float32 in (0, 1).

    params are PyTorch-layout (w: [out, in], b: [out]) for the three Linears.
    """
    w1, b1, w2, b2, w3, b3 = params
    B, S = state.shape
    H1, H2, OUT = w1.shape[0], w2.shape[0], w3.shape[0]
    assert w1.shape == (H1, S) and w2.shape == (H2, H1) and w3.shape == (OUT, H2)
    assert OUT == 1

    # --- one-time operand prep (plain XLA, negligible) -----------------------
    w1c = w1.astype(compute_dtype)                      # [H1, S]
    w2c = w2.astype(compute_dtype)                      # [H2, H1]
    w3_col = w3.T.astype(jnp.float32)                   # [H2, 1]  stays f32
    b1c = b1.reshape(H1, 1).astype(jnp.float32)
    b2c = b2.reshape(H2, 1).astype(jnp.float32)
    b3c = b3.reshape(OUT, 1).astype(jnp.float32)

    # --- batch padding & tile choice -----------------------------------------
    b_pad = pl.cdiv(B, LANE) * LANE
    tile_b = min(tile_b, b_pad)
    if b_pad >= 2 * LANE:
        tile_b = min(tile_b, b_pad // 2)    # >= 2 grid steps -> both v7x TCs busy
    tile_b = max(LANE, (tile_b // LANE) * LANE)
    b_pad = pl.cdiv(b_pad, tile_b) * tile_b
    grid = (b_pad // tile_b,)

    x = state.astype(compute_dtype)
    if b_pad != B:
        x = jnp.pad(x, ((0, b_pad - B), (0, 0)))        # zero rows, sliced off later

    const2d = lambda i: (0, 0)   # grid-invariant blocks: DMA'd once
    out_t = pl.pallas_call(
        _actor_kernel,
        out_shape=jax.ShapeDtypeStruct((OUT, b_pad), jnp.float32),
        grid_spec=pltpu.PrefetchScalarGridSpec(
            num_scalar_prefetch=0,
            grid=grid,
            in_specs=[
                pl.BlockSpec((tile_b, S), lambda i: (i, 0)),   # x tile (natural)
                pl.BlockSpec(w1c.shape, const2d),              # W1
                pl.BlockSpec(w2c.shape, const2d),              # W2
                pl.BlockSpec(w3_col.shape, const2d),           # w3 column (f32)
                pl.BlockSpec(b1c.shape, const2d),              # b1 (f32)
                pl.BlockSpec(b2c.shape, const2d),              # b2 (f32)
                pl.BlockSpec(b3c.shape, const2d),              # b3 (f32)
            ],
            out_specs=pl.BlockSpec((OUT, tile_b), lambda i: (0, i)),
        ),
        compiler_params=pltpu.CompilerParams(
            dimension_semantics=("parallel",),   # batch tiles are independent
        ),
    )(x, w1c, w2c, w3_col, b1c, b2c, b3c)

    return out_t[:, :B].T            # [B, 1] float32


def init_params(key, state_dim=16, h1=256, h2=128, out=1):
    """PyTorch nn.Linear default init (U(-1/sqrt(fan_in), +)), torch layout."""
    ks = jax.random.split(key, 6)

    def linear(kw, kb, fan_in, fan_out):
        bound = 1.0 / (fan_in ** 0.5)
        w = jax.random.uniform(kw, (fan_out, fan_in), jnp.float32, -bound, bound)
        b = jax.random.uniform(kb, (fan_out,), jnp.float32, -bound, bound)
        return w, b

    w1, b1 = linear(ks[0], ks[1], state_dim, h1)
    w2, b2 = linear(ks[2], ks[3], h1, h2)
    w3, b3 = linear(ks[4], ks[5], h2, out)
    return (w1, b1, w2, b2, w3, b3)


def _reference(state, params):
    w1, b1, w2, b2, w3, b3 = params
    h1 = jnp.maximum(state @ w1.T + b1, 0.0)
    h2 = jnp.maximum(h1 @ w2.T + b2, 0.0)
    return jax.nn.sigmoid(h2 @ w3.T + b3)


if __name__ == "__main__":
    key = jax.random.PRNGKey(0)
    k_x, k_p, k_x2 = jax.random.split(key, 3)

    batch, state_dim = 32, 16
    state = jax.random.normal(k_x, (batch, state_dim), dtype=jnp.float32)
    params = init_params(k_p, state_dim)
    ref = _reference(state, params)

    # Default path: bf16 MXU operands, f32 accumulation / bias / ReLU / sigmoid.
    out = jax.block_until_ready(ap_actor_forward(state, params))
    assert out.shape == (batch, 1), out.shape
    assert jnp.allclose(out, ref, atol=2e-2), "bf16 mismatch vs reference"

    # f32-operand path matches the PyTorch forward semantics tightly.
    out_f32 = jax.block_until_ready(
        ap_actor_forward(state, params, compute_dtype=jnp.float32))
    assert out_f32.shape == (batch, 1), out_f32.shape
    assert jnp.allclose(out_f32, ref, atol=1e-4, rtol=1e-4), "f32 mismatch vs reference"

    # Ragged batch -> exercises zero-padding and the multi-step (>=2) grid path.
    batch2 = 300
    state2 = jax.random.normal(k_x2, (batch2, state_dim), dtype=jnp.float32)
    ref2 = _reference(state2, params)
    out2 = jax.block_until_ready(
        ap_actor_forward(state2, params, compute_dtype=jnp.float32))
    assert out2.shape == (batch2, 1), out2.shape
    assert jnp.allclose(out2, ref2, atol=1e-4, rtol=1e-4), "ragged-batch mismatch"

    print("KERNEL_OK")
</pallas_src>

<mosaic_0001>
module attributes {stable_mosaic.version = 11 : i64} {
  func.func @_actor_kernel(%arg0: i32, %arg1: memref<128x16xbf16, #tpu.memory_space<vmem>>, %arg2: memref<256x16xbf16, #tpu.memory_space<vmem>>, %arg3: memref<128x256xbf16, #tpu.memory_space<vmem>>, %arg4: memref<128x1xf32, #tpu.memory_space<vmem>>, %arg5: memref<256x1xf32, #tpu.memory_space<vmem>>, %arg6: memref<128x1xf32, #tpu.memory_space<vmem>>, %arg7: memref<1x1xf32, #tpu.memory_space<vmem>>, %arg8: memref<1x128xf32, #tpu.memory_space<vmem>>) attributes {dimension_semantics = [#tpu.dimension_semantics<parallel>], iteration_bounds = array<i64: 1>, scalar_prefetch = 0 : i64, scratch_operands = 0 : i64, tpu.core_type = #tpu.core_type<tc>, window_params = [{transform_indices = @transform_0, window_bounds = array<i64: 128, 16>}, {pipeline_mode = #tpu.pipeline_mode<synchronous>, transform_indices = @transform_1, window_bounds = array<i64: 256, 16>}, {pipeline_mode = #tpu.pipeline_mode<synchronous>, transform_indices = @transform_2, window_bounds = array<i64: 128, 256>}, {pipeline_mode = #tpu.pipeline_mode<synchronous>, transform_indices = @transform_3, window_bounds = array<i64: 128, 1>}, {pipeline_mode = #tpu.pipeline_mode<synchronous>, transform_indices = @transform_4, window_bounds = array<i64: 256, 1>}, {pipeline_mode = #tpu.pipeline_mode<synchronous>, transform_indices = @transform_5, window_bounds = array<i64: 128, 1>}, {pipeline_mode = #tpu.pipeline_mode<synchronous>, transform_indices = @transform_6, window_bounds = array<i64: 1, 1>}, {transform_indices = @transform_7, window_bounds = array<i64: 1, 128>}]} {
    %c0 = arith.constant 0 : index
    %c0_0 = arith.constant 0 : index
    %0 = vector.load %arg1[%c0, %c0_0] : memref<128x16xbf16, #tpu.memory_space<vmem>>, vector<128x16xbf16>
    %c0_1 = arith.constant 0 : index
    %c0_2 = arith.constant 0 : index
    %1 = vector.load %arg2[%c0_1, %c0_2] : memref<256x16xbf16, #tpu.memory_space<vmem>>, vector<256x16xbf16>
    %cst = arith.constant dense<0.000000e+00> : vector<256x128xf32>
    %2 = tpu.matmul %1, %0, %cst {dimension_numbers = #tpu.dot_dimension_numbers<[1], [1], [0], [0], [0, 0, 1, 0], [], []>} : vector<256x16xbf16>, vector<128x16xbf16>, vector<256x128xf32> -> vector<256x128xf32>
    %c0_3 = arith.constant 0 : index
    %c0_4 = arith.constant 0 : index
    %3 = vector.load %arg5[%c0_3, %c0_4] : memref<256x1xf32, #tpu.memory_space<vmem>>, vector<256x1xf32>
    %4 = vector.broadcast %3 : vector<256x1xf32> to vector<256x128xf32>
    %5 = arith.addf %2, %4 : vector<256x128xf32>
    %cst_5 = arith.constant 0.000000e+00 : f32
    %6 = vector.broadcast %cst_5 : f32 to vector<256x128xf32>
    %7 = arith.maximumf %5, %6 : vector<256x128xf32>
    %c0_6 = arith.constant 0 : index
    %c0_7 = arith.constant 0 : index
    %8 = vector.load %arg3[%c0_6, %c0_7] : memref<128x256xbf16, #tpu.memory_space<vmem>>, vector<128x256xbf16>
    %9 = arith.truncf %7 : vector<256x128xf32> to vector<256x128xbf16>
    %cst_8 = arith.constant dense<0.000000e+00> : vector<128x128xf32>
    %10 = tpu.matmul %8, %9, %cst_8 {dimension_numbers = #tpu.dot_dimension_numbers<[1], [0], [0], [1], [0, 0, 1, 1], [], []>} : vector<128x256xbf16>, vector<256x128xbf16>, vector<128x128xf32> -> vector<128x128xf32>
    %c0_9 = arith.constant 0 : index
    %c0_10 = arith.constant 0 : index
    %11 = vector.load %arg6[%c0_9, %c0_10] : memref<128x1xf32, #tpu.memory_space<vmem>>, vector<128x1xf32>
    %12 = vector.broadcast %11 : vector<128x1xf32> to vector<128x128xf32>
    %13 = arith.addf %10, %12 : vector<128x128xf32>
    %cst_11 = arith.constant 0.000000e+00 : f32
    %14 = vector.broadcast %cst_11 : f32 to vector<128x128xf32>
    %15 = arith.maximumf %13, %14 : vector<128x128xf32>
    %c0_12 = arith.constant 0 : index
    %c0_13 = arith.constant 0 : index
    %16 = vector.load %arg4[%c0_12, %c0_13] : memref<128x1xf32, #tpu.memory_space<vmem>>, vector<128x1xf32>
    %17 = vector.broadcast %16 : vector<128x1xf32> to vector<128x128xf32>
    %18 = arith.mulf %17, %15 : vector<128x128xf32>
    %cst_14 = arith.constant dense<0.000000e+00> : vector<128xf32>
    %19 = vector.multi_reduction <add>, %18, %cst_14 [0] : vector<128x128xf32> to vector<128xf32>
    %20 = vector.shape_cast %19 : vector<128xf32> to vector<1x128xf32>
    %c0_15 = arith.constant 0 : index
    %c0_16 = arith.constant 0 : index
    %21 = vector.load %arg7[%c0_15, %c0_16] : memref<1x1xf32, #tpu.memory_space<vmem>>, vector<1x1xf32>
    %22 = vector.broadcast %21 : vector<1x1xf32> to vector<1x128xf32>
    %23 = arith.addf %20, %22 : vector<1x128xf32>
    %24 = arith.negf %23 : vector<1x128xf32>
    %25 = math.exp %24 : vector<1x128xf32>
    %cst_17 = arith.constant 1.000000e+00 : f32
    %26 = vector.broadcast %cst_17 : f32 to vector<1x128xf32>
    %27 = arith.addf %26, %25 : vector<1x128xf32>
    %28 = arith.divf %26, %27 : vector<1x128xf32>
    %c0_18 = arith.constant 0 : index
    %c0_19 = arith.constant 0 : index
    %29 = vector.load %arg8[%c0_18, %c0_19] : memref<1x128xf32, #tpu.memory_space<vmem>>, vector<1x128xf32>
    tpu.vector_store %arg8[%c0_18, %c0_19], %28 {strides = array<i32>} : memref<1x128xf32, #tpu.memory_space<vmem>>, vector<1x128xf32>,
    return
  }
  func.func @transform_0(%arg0: i32) -> (i32, i32) {
    %c0_i32 = arith.constant 0 : i32
    %c0_i32_0 = arith.constant 0 : i32
    return %arg0, %c0_i32 : i32, i32
  }
  func.func @transform_1(%arg0: i32) -> (i32, i32) {
    %c0_i32 = arith.constant 0 : i32
    %c0_i32_0 = arith.constant 0 : i32
    %c0_i32_1 = arith.constant 0 : i32
    return %c0_i32, %c0_i32_0 : i32, i32
  }
  func.func @transform_2(%arg0: i32) -> (i32, i32) {
    %c0_i32 = arith.constant 0 : i32
    %c0_i32_0 = arith.constant 0 : i32
    %c0_i32_1 = arith.constant 0 : i32
    return %c0_i32, %c0_i32_0 : i32, i32
  }
  func.func @transform_3(%arg0: i32) -> (i32, i32) {
    %c0_i32 = arith.constant 0 : i32
    %c0_i32_0 = arith.constant 0 : i32
    %c0_i32_1 = arith.constant 0 : i32
    return %c0_i32, %c0_i32_0 : i32, i32
  }
  func.func @transform_4(%arg0: i32) -> (i32, i32) {
    %c0_i32 = arith.constant 0 : i32
    %c0_i32_0 = arith.constant 0 : i32
    %c0_i32_1 = arith.constant 0 : i32
    return %c0_i32, %c0_i32_0 : i32, i32
  }
  func.func @transform_5(%arg0: i32) -> (i32, i32) {
    %c0_i32 = arith.constant 0 : i32
    %c0_i32_0 = arith.constant 0 : i32
    %c0_i32_1 = arith.constant 0 : i32
    return %c0_i32, %c0_i32_0 : i32, i32
  }
  func.func @transform_6(%arg0: i32) -> (i32, i32) {
    %c0_i32 = arith.constant 0 : i32
    %c0_i32_0 = arith.constant 0 : i32
    %c0_i32_1 = arith.constant 0 : i32
    return %c0_i32, %c0_i32_0 : i32, i32
  }
  func.func @transform_7(%arg0: i32) -> (i32, i32) {
    %c0_i32 = arith.constant 0 : i32
    %c0_i32_0 = arith.constant 0 : i32
    return %c0_i32, %arg0 : i32, i32
  }
}

</mosaic_0001>

<bundles_post_ra>
// kernel: tpu_custom_call.1
= control target key start
LH: loop header
LB: loop body
LE: loop exit
PB: predicated region body
PF: predicated region fallthrough
CT: control target
= control target key end

     0   :  { %s1888_s0 = inlined_call_operand.vmem [shape: bf16[128,16], index: 0, kind: input, shape index: {}]   ;;  %s1889_s1 = inlined_call_operand.vmem [shape: bf16[256,16], index: 1, kind: input, shape index: {}]   ;;  %s1890_s2 = inlined_call_operand.vmem [shape: bf16[128,256], index: 2, kind: input, shape index: {}]   ;;  %s1891_s3 = inlined_call_operand.vmem [shape: f32[128,1], index: 3, kind: input, shape index: {}]   ;;  %s1892_s4 = inlined_call_operand.vmem [shape: f32[256,1], index: 4, kind: input, shape index: {}]   ;;  %s1893_s5 = inlined_call_operand.vmem [shape: f32[128,1], index: 5, kind: input, shape index: {}]   ;;  %s1894_s6 = inlined_call_operand.<no memory space> [shape: f32[1,1], index: 6, kind: input, shape index: {}]   ;;  %s1895_s7 = inlined_call_operand.hbm [shape: f32[1,128], index: 7, kind: output, shape index: {}]  }
   0x1   :  { %v12_v0 = vstv %s1894_s6 }
   0x2   :  { %13 = vst [vmem:[#allocation2] sm:$0x1] %v12_v0 }
   0x3   :  { %v107_v1 = vld [vmem:[%s1892_s4 + $0xf0] sm:$0xff]  ;;  %v77_v2 = vld [vmem:[%s1892_s4] sm:$0xff]  ;;  %v1266_v3 = vld [vmem:[%s1888_s0 + $0x38] sm:$0xff]  ;;  %vm389_vm0 = vcmask 130048   ;;  %v1342_v4 = vmov 0  }
   0x4   :  { %1310 = vset.pattern.permute.xlu1 %v1342_v4  ;;  %1309 = vset.pattern.permute.xlu0 %v1342_v4  ;;  %v460_v5 = vsel %vm389_vm0, %v1266_v3, 0  ;;  %v1265_v6 = vld [vmem:[%s1888_s0 + $0x30] sm:$0xff] }
   0x5   :  { %261 = vperm.xlu1 %1310, %v107_v1   ;;  %111 = vperm.xlu0 %1309, %v77_v2   ;;  %v91_v7 = vld [vmem:[%s1892_s4 + $0x70] sm:$0xff] }
   0x6   :  { %462 = vmatpush.bf16.xpose.msra.mxu0 %v460_v5  ;;  %1299 = vmatpush.bf16.xpose.msra.mxu3 %v460_v5 }
   0x7   :  { %1311 = vset.pattern.permute.xlu2 %v1342_v4 }
   0x8   :  { %14 = vsyncpa [#allocation4], 0  ;;  %181 = vperm.xlu2 %1311, %v91_v7   ;;  %v108_v8 = vld [vmem:[%s1892_s4 + $0xf8] sm:$0xff]  ;;  %v78_v9 = vld [vmem:[%s1892_s4 + $0x8] sm:$0xff]  ;;  %v457_v10 = vsel %vm389_vm0, %v1265_v6, 0  ;;  %s1073_s8 = sshll.u32 %s1895_s7, 4  ;;  %s1074_s8 = int_to_ptr.hbm [resolvable:$true] %s1073_s8 }
   0x9   :  { %v92_v11 = vld [vmem:[%s1892_s4 + $0x78] sm:$0xff]  ;;  %v1264_v12 = vld [vmem:[%s1888_s0 + $0x28] sm:$0xff]  ;;  %v105_v14 = vld [vmem:[%s1892_s4 + $0xe0] sm:$0xff] }
   0xa   :  { %v106_v13 = vld [vmem:[%s1892_s4 + $0xe8] sm:$0xff]  ;;  %v454_v15 = vsel %vm389_vm0, %v1264_v12, 0  ;;  %v89_v16 = vld [vmem:[%s1892_s4 + $0x60] sm:$0xff]  ;;  %v103_v18 = vld [vmem:[%s1892_s4 + $0xd0] sm:$0xff] }
   0xb   :  { %v1263_v17 = vld [vmem:[%s1888_s0 + $0x20] sm:$0xff]  ;;  %v90_v19 = vld [vmem:[%s1892_s4 + $0x68] sm:$0xff]  ;;  %v104_v21 = vld [vmem:[%s1892_s4 + $0xd8] sm:$0xff] }
   0xc   :  { %v451_v20 = vsel %vm389_vm0, %v1263_v17, 0  ;;  %v1262_v22 = vld [vmem:[%s1888_s0 + $0x18] sm:$0xff]  ;;  %v87_v24 = vld [vmem:[%s1892_s4 + $0x50] sm:$0xff]  ;;  %v101_v26 = vld [vmem:[%s1892_s4 + $0xc0] sm:$0xff] }
   0xd   :  { %266 = vperm.xlu1 %1310, %v108_v8   ;;  %116 = vperm.xlu0 %1309, %v78_v9   ;;  %v88_v23 = vld [vmem:[%s1892_s4 + $0x58] sm:$0xff]  ;;  %v448_v25 = vsel %vm389_vm0, %v1262_v22, 0  ;;  %v1261_v27 = vld [vmem:[%s1888_s0 + $0x10] sm:$0xff]  ;;  %v85_v28 = vld [vmem:[%s1892_s4 + $0x40] sm:$0xff] }
   0xe   :  { %463 = vmatpush.bf16.xpose.msra.mxu0 %v457_v10  ;;  %1300 = vmatpush.bf16.xpose.msra.mxu3 %v457_v10  ;;  %v102_v29 = vld [vmem:[%s1892_s4 + $0xc8] sm:$0xff]  ;;  %v445_v30 = vsel %vm389_vm0, %v1261_v27, 0  ;;  %v100_v33 = vld [vmem:[%s1892_s4 + $0xb8] sm:$0xff]  ;;  %v99_v34 = vld [vmem:[%s1892_s4 + $0xb0] sm:$0xff] }
   0xf   :  { %v86_v31 = vld [vmem:[%s1892_s4 + $0x48] sm:$0xff]  ;;  %v83_v36 = vld [vmem:[%s1892_s4 + $0x30] sm:$0xff]  ;;  %v1259_v37 = vld [vmem:[%s1888_s0] sm:$0xff] }
  0x10   :  { %186 = vperm.xlu2 %1311, %v92_v11   ;;  %v1260_v32 = vld [vmem:[%s1888_s0 + $0x8] sm:$0xff]  ;;  %v97_v38 = vld [vmem:[%s1892_s4 + $0xa0] sm:$0xff]  ;;  %v84_v39 = vld [vmem:[%s1892_s4 + $0x38] sm:$0xff]  ;;  %v439_v40 = vsel %vm389_vm0, %v1259_v37, 0 }
  0x11   :  { %v442_v35 = vsel %vm389_vm0, %v1260_v32, 0  ;;  %v98_v41 = vld [vmem:[%s1892_s4 + $0xa8] sm:$0xff]  ;;  %v81_v43 = vld [vmem:[%s1892_s4 + $0x20] sm:$0xff]  ;;  %v1274_v45 = vld [vmem:[%s1889_s1 + $0x38] sm:$0xff] }
  0x12   :  { %v82_v42 = vld [vmem:[%s1892_s4 + $0x28] sm:$0xff]  ;;  %v1267_v44 = vld [vmem:[%s1889_s1] sm:$0xff]  ;;  %v95_v46 = vld [vmem:[%s1892_s4 + $0x90] sm:$0xff] }
  0x13   :  { %v79_v47 = vld [vmem:[%s1892_s4 + $0x10] sm:$0xff]  ;;  %v96_v48 = vld [vmem:[%s1892_s4 + $0x98] sm:$0xff]  ;;  %v94_v50 = vld [vmem:[%s1892_s4 + $0x88] sm:$0xff] }
  0x14   :  { %v80_v49 = vld [vmem:[%s1892_s4 + $0x18] sm:$0xff]  ;;  %v93_v51 = vld [vmem:[%s1892_s4 + $0x80] sm:$0xff]  ;;  %v1268_v52 = vld [vmem:[%s1889_s1 + $0x8] sm:$0xff] }
  0x15   :  { %256 = vperm.xlu1 %1310, %v106_v13   ;;  %251 = vperm.xlu0 %1309, %v105_v14   ;;  %v1275_v53 = vld [vmem:[%s1889_s1 + $0x40] sm:$0xff]  ;;  %v617_v55 = vld [vmem:[%s1893_s5 + $0x10] sm:$0xff]  ;;  %v616_v56 = vld [vmem:[%s1893_s5 + $0x8] sm:$0xff] }
  0x16   :  { %464 = vmatpush.bf16.xpose.msra.mxu0 %v454_v15  ;;  %1301 = vmatpush.bf16.xpose.msra.mxu3 %v454_v15  ;;  %v615_v54 = vld [vmem:[%s1893_s5] sm:$0xff]  ;;  %v618_v57 = vld [vmem:[%s1893_s5 + $0x18] sm:$0xff]  ;;  %v620_v58 = vld [vmem:[%s1893_s5 + $0x28] sm:$0xff] }
  0x17   :  { %v619_v59 = vld [vmem:[%s1893_s5 + $0x20] sm:$0xff]  ;;  %v1269_v60 = vld [vmem:[%s1889_s1 + $0x10] sm:$0xff]  ;;  %v1276_v61 = vld [vmem:[%s1889_s1 + $0x48] sm:$0xff] }
  0x18   :  { %171 = vperm.xlu2 %1311, %v89_v16   ;;  %v621_v62 = vld [vmem:[%s1893_s5 + $0x30] sm:$0xff]  ;;  %v623_v63 = vld [vmem:[%s1893_s5 + $0x40] sm:$0xff]  ;;  %v622_v0 = vld [vmem:[%s1893_s5 + $0x38] sm:$0xff] }
  0x19   :  { %v624_v1 = vld [vmem:[%s1893_s5 + $0x48] sm:$0xff]  ;;  %v626_v2 = vld [vmem:[%s1893_s5 + $0x58] sm:$0xff]  ;;  %v625_v3 = vld [vmem:[%s1893_s5 + $0x50] sm:$0xff] }
  0x1a   :  { %v1270_v4 = vld [vmem:[%s1889_s1 + $0x18] sm:$0xff]  ;;  %v1277_v5 = vld [vmem:[%s1889_s1 + $0x50] sm:$0xff]  ;;  %v627_v6 = vld [vmem:[%s1893_s5 + $0x60] sm:$0xff] }
  0x1b   :  { %v905_v7 = vld [vmem:[%s1891_s3] sm:$0xff]  ;;  %v628_v8 = vld [vmem:[%s1893_s5 + $0x68] sm:$0xff]  ;;  %v908_v12 = vld [vmem:[%s1891_s3 + $0x18] sm:$0xff] }
  0x1c   :  { %v906_v11 = vld [vmem:[%s1891_s3 + $0x8] sm:$0xff]  ;;  %v907_v13 = vld [vmem:[%s1891_s3 + $0x10] sm:$0xff]  ;;  %v1271_v14 = vld [vmem:[%s1889_s1 + $0x20] sm:$0xff] }
  0x1d   :  { %241 = vperm.xlu1 %1310, %v103_v18   ;;  %176 = vperm.xlu0 %1309, %v90_v19   ;;  %v1278_v15 = vld [vmem:[%s1889_s1 + $0x58] sm:$0xff]  ;;  %v909_v19 = vld [vmem:[%s1891_s3 + $0x20] sm:$0xff] }
  0x1e   :  { %465 = vmatpush.bf16.xpose.msra.mxu0 %v451_v20  ;;  %1302 = vmatpush.bf16.xpose.msra.mxu3 %v451_v20  ;;  %v911_v20 = vld [vmem:[%s1891_s3 + $0x30] sm:$0xff]  ;;  %v913_v27 = vld [vmem:[%s1891_s3 + $0x40] sm:$0xff] }
  0x20   :  { %246 = vperm.xlu2 %1311, %v104_v21   ;;  %v910_v21 = vld [vmem:[%s1891_s3 + $0x28] sm:$0xff] }
  0x25   :  { %166 = vperm.xlu1 %1310, %v88_v23   ;;  %161 = vperm.xlu0 %1309, %v87_v24   ;;  %v912_v24 = vld [vmem:[%s1891_s3 + $0x38] sm:$0xff] }
  0x26   :  { %466 = vmatpush.bf16.xpose.msra.mxu0 %v448_v25  ;;  %1303 = vmatpush.bf16.xpose.msra.mxu3 %v448_v25 }
  0x28   :  { %231 = vperm.xlu2 %1311, %v101_v26   ;;  %v914_v26 = vld [vmem:[%s1891_s3 + $0x48] sm:$0xff] }
  0x2d   :  { %151 = vperm.xlu1 %1310, %v85_v28   ;;  %236 = vperm.xlu0 %1309, %v102_v29   ;;  %v1272_v28 = vld [vmem:[%s1889_s1 + $0x28] sm:$0xff]  ;;  %v1279_v29 = vld [vmem:[%s1889_s1 + $0x60] sm:$0xff] }
  0x2e   :  { %467 = vmatpush.bf16.xpose.msra.mxu0 %v445_v30  ;;  %1304 = vmatpush.bf16.xpose.msra.mxu3 %v445_v30 }
  0x30   :  { %156 = vperm.xlu2 %1311, %v86_v31   ;;  %v915_v31 = vld [vmem:[%s1891_s3 + $0x50] sm:$0xff] }
  0x35   :  { %226 = vperm.xlu1 %1310, %v100_v33   ;;  %221 = vperm.xlu0 %1309, %v99_v34   ;;  %v916_v33 = vld [vmem:[%s1891_s3 + $0x58] sm:$0xff]  ;;  %v629_v34 = vld [vmem:[%s1893_s5 + $0x70] sm:$0xff] }
  0x36   :  { %468 = vmatpush.bf16.xpose.msra.mxu0 %v442_v35  ;;  %1305 = vmatpush.bf16.xpose.msra.mxu3 %v442_v35 }
  0x38   :  { %141 = vperm.xlu2 %1311, %v83_v36   ;;  %v630_v36 = vld [vmem:[%s1893_s5 + $0x78] sm:$0xff] }
  0x3d   :  { %211 = vperm.xlu1 %1310, %v97_v38   ;;  %146 = vperm.xlu0 %1309, %v84_v39   ;;  %v918_v38 = vld [vmem:[%s1891_s3 + $0x68] sm:$0xff]  ;;  %v917_v39 = vld [vmem:[%s1891_s3 + $0x60] sm:$0xff] }
  0x3e   :  { %469 = vmatpush.bf16.xpose.msra.mxu0 %v439_v40  ;;  %1306 = vmatpush.bf16.xpose.msra.mxu3 %v439_v40  ;;  %v1273_v40 = vld [vmem:[%s1889_s1 + $0x30] sm:$0xff] }
  0x40   :  { %216 = vperm.xlu2 %1311, %v98_v41   ;;  %v1280_v41 = vld [vmem:[%s1889_s1 + $0x68] sm:$0xff] }
  0x45   :  { %136 = vperm.xlu1 %1310, %v82_v42   ;;  %131 = vperm.xlu0 %1309, %v81_v43  }
  0x46   :  { %1178 = vmatmul.msk.bf16.vlgmr.msra.gmra.mxu0 %vm389_vm0, %v1267_v44  ;;  %1185 = vmatmul.msk.bf16.vlgmr.msra.gmra.mxu3 %vm389_vm0, %v1274_v45  ;;  %v1038_v44 = vld [vmem:[#allocation2] sm:$0x1]  ;;  %v920_v45 = vld [vmem:[%s1891_s3 + $0x78] sm:$0xff] }
  0x48   :  { %201 = vperm.xlu2 %1311, %v95_v46   ;;  %v919_v46 = vld [vmem:[%s1891_s3 + $0x70] sm:$0xff] }
  0x4d   :  { %121 = vperm.xlu1 %1310, %v79_v47   ;;  %206 = vperm.xlu0 %1309, %v96_v48  }
  0x50   :  { %126 = vperm.xlu2 %1311, %v80_v49  }
  0x55   :  { %196 = vperm.xlu1 %1310, %v94_v50   ;;  %191 = vperm.xlu0 %1309, %v93_v51   ;;  %v1281_v50 = vld [vmem:[%s1889_s1 + $0x70] sm:$0xff] }
  0x56   :  { %1179 = vmatmul.msk.bf16.gmra.mxu0 %vm389_vm0, %v1268_v52  ;;  %1186 = vmatmul.msk.bf16.gmra.mxu3 %vm389_vm0, %v1275_v53 }
  0x58   :  { %633 = vperm.xlu2 %1311, %v615_v54  }
  0x5d   :  { %643 = vperm.xlu1 %1310, %v617_v55   ;;  %638 = vperm.xlu0 %1309, %v616_v56   ;;  %v1282_v56 = vld [vmem:[%s1889_s1 + $0x78] sm:$0xff] }
  0x60   :  { %648 = vperm.xlu2 %1311, %v618_v57  }
  0x62   :  { %v1611_v16 = vpop.permute.xlu2 %181 }
  0x65   :  { %658 = vperm.xlu1 %1310, %v620_v58   ;;  %653 = vperm.xlu0 %1309, %v619_v59  }
  0x66   :  { %1180 = vmatmul.msk.bf16.gmra.mxu0 %vm389_vm0, %v1269_v60  ;;  %1187 = vmatmul.msk.bf16.gmra.mxu3 %vm389_vm0, %v1276_v61 }
  0x68   :  { %663 = vperm.xlu2 %1311, %v621_v62  }
  0x6a   :  { %v1628_v22 = vpop.permute.xlu2 %186 }
  0x6d   :  { %673 = vperm.xlu1 %1310, %v623_v63   ;;  %668 = vperm.xlu0 %1309, %v622_v0  }
  0x70   :  { %678 = vperm.xlu2 %1311, %v624_v1  }
  0x72   :  { %v1651_v30 = vpop.permute.xlu2 %171 }
  0x75   :  { %688 = vperm.xlu1 %1310, %v626_v2   ;;  %683 = vperm.xlu0 %1309, %v625_v3  }
  0x76   :  { %1181 = vmatmul.msk.bf16.gmra.mxu0 %vm389_vm0, %v1270_v4  ;;  %1188 = vmatmul.msk.bf16.gmra.mxu3 %vm389_vm0, %v1277_v5 }
  0x77   :  { %v1592_v9 = vpop.permute.xlu0 %111  ;;  %v1594_v10 = vpop.permute.xlu1 %261 }
  0x78   :  { %693 = vperm.xlu2 %1311, %v627_v6  }
  0x7a   :  { %v1669_v37 = vpop.permute.xlu2 %246 }
  0x7d   :  { %923 = vperm.xlu1 %1310, %v905_v7   ;;  %698 = vperm.xlu0 %1309, %v628_v8  }
  0x7f   :  { %v1613_v17 = vpop.permute.xlu0 %116  ;;  %v1617_v18 = vpop.permute.xlu1 %266 }
  0x80   :  { %928 = vperm.xlu2 %1311, %v906_v11  }
  0x82   :  { %v1695_v47 = vpop.permute.xlu2 %231 }
  0x85   :  { %938 = vperm.xlu1 %1310, %v908_v12   ;;  %933 = vperm.xlu0 %1309, %v907_v13  }
  0x86   :  { %1182 = vmatmul.msk.bf16.gmra.mxu0 %vm389_vm0, %v1271_v14  ;;  %1189 = vmatmul.msk.bf16.gmra.mxu3 %vm389_vm0, %v1278_v15 }
  0x87   :  { %v1630_v23 = vpop.permute.xlu0 %251  ;;  %v1635_v25 = vpop.permute.xlu1 %256 }
  0x88   :  { %943 = vperm.xlu2 %1311, %v909_v19  }
  0x8a   :  { %v1704_v51 = vpop.permute.xlu2 %156 }
  0x8d   :  { %953 = vperm.xlu1 %1310, %v911_v20   ;;  %948 = vperm.xlu0 %1309, %v910_v21  }
  0x8f   :  { %v1656_v32 = vpop.permute.xlu0 %176  ;;  %v1664_v35 = vpop.permute.xlu1 %241 }
  0x90   :  { %958 = vperm.xlu2 %1311, %v912_v24  }
  0x92   :  { %v1711_v54 = vpop.permute.xlu2 %141 }
  0x95   :  { %968 = vperm.xlu1 %1310, %v914_v26   ;;  %963 = vperm.xlu0 %1309, %v913_v27  }
  0x96   :  { %1183 = vmatmul.msk.bf16.gmra.mxu0 %vm389_vm0, %v1272_v28  ;;  %1190 = vmatmul.msk.bf16.gmra.mxu3 %vm389_vm0, %v1279_v29 }
  0x97   :  { %v1683_v42 = vpop.permute.xlu0 %161  ;;  %v1685_v43 = vpop.permute.xlu1 %166 }
  0x98   :  { %973 = vperm.xlu2 %1311, %v915_v31  }
  0x9a   :  { %v217_v59 = vpop.permute.xlu2 %216 }
  0x9d   :  { %978 = vperm.xlu1 %1310, %v916_v33   ;;  %703 = vperm.xlu0 %1309, %v629_v34  }
  0x9f   :  { %v1697_v48 = vpop.permute.xlu0 %236  ;;  %v1699_v49 = vpop.permute.xlu1 %151 }
  0xa0   :  { %708 = vperm.xlu2 %1311, %v630_v36  }
  0xa2   :  { %v202_v7 = vpop.permute.xlu2 %201 }
  0xa5   :  { %988 = vperm.xlu1 %1310, %v918_v38   ;;  %983 = vperm.xlu0 %1309, %v917_v39  }
  0xa6   :  { %1184 = vmatmul.msk.bf16.gmra.mxu0 %vm389_vm0, %v1273_v40  ;;  %1191 = vmatmul.msk.bf16.gmra.mxu3 %vm389_vm0, %v1280_v41 }
  0xa7   :  { %v1707_v52 = vpop.permute.xlu0 %221  ;;  %v1709_v53 = vpop.permute.xlu1 %226 }
  0xa8   :  { %993 = vperm.xlu2 %1311, %v919_v46  }
  0xad   :  { %1041 = vperm.xlu1 %1310, %v1038_v44   ;;  %998 = vperm.xlu0 %1309, %v920_v45  }
  0xaf   :  { %v1713_v55 = vpop.permute.xlu0 %146  ;;  %v212_v57 = vpop.permute.xlu1 %211 }
  0xb6   :  { %1192 = vmatmul.msk.bf16.gmra.mxu3 %vm389_vm0, %v1281_v50 }
  0xb7   :  { %v132_v61 = vpop.permute.xlu0 %131  ;;  %v137_v0 = vpop.permute.xlu1 %136 }
  0xbf   :  { %v207_v13 = vpop.permute.xlu0 %206  ;;  %v122_v19 = vpop.permute.xlu1 %121 }
  0xc3   :  { %v471_v58 = vpop.f32.mrf.mxu0 }
  0xc4   :  { %v472_v1 = vadd.f32 %v471_v58, %v1592_v9  ;;  %v127_v9 = vpop.permute.xlu2 %126 }
  0xc6   :  { %1193 = vmatmul.msk.bf16.gmra.mxu3 %vm389_vm0, %v1282_v56  ;;  %v551_v4 = vmax.f32 %v472_v1, 0.0 }
  0xc7   :  { %v192_v24 = vpop.permute.xlu0 %191  ;;  %v197_v27 = vpop.permute.xlu1 %196 }
  0xc9   :  { %v506_v60 = vpop.f32.mrf.mxu3 }
  0xca   :  { %v507_v2 = vadd.f32 %v506_v60, %v1611_v16 }
  0xcb   :  { %v473_v62 = vpop.f32.mrf.mxu0 }
  0xcc   :  { %v474_v63 = vadd.f32 %v473_v62, %v1613_v17  ;;  %v565_v11 = vmax.f32 %v507_v2, 0.0 }
  0xce   :  { %v552_v5 = vmax.f32 %v474_v63, 0.0 }
  0xd0   :  { %v1723_v15 = vpack.c.bf16 %v552_v5, %v551_v4 }
  0xd1   :  { %v508_v3 = vpop.f32.mrf.mxu3 }
  0xd2   :  { %v509_v6 = vadd.f32 %v508_v3, %v1628_v22 }
  0xd3   :  { %v476_v8 = vpop.f32.mrf.mxu0 }
  0xd4   :  { %v566_v12 = vmax.f32 %v509_v6, 0.0  ;;  %v477_v21 = vadd.f32 %v476_v8, %v122_v19 }
  0xd6   :  { %v606_v14 = vpack.c.bf16 %v566_v12, %v565_v11  ;;  %v553_v22 = vmax.f32 %v477_v21, 0.0 }
  0xd8   :  { %791 = vmatpush.bf16.msra.mxu1 %v606_v14 }
  0xd9   :  { %v511_v17 = vpop.f32.mrf.mxu3 }
  0xda   :  { %v512_v26 = vadd.f32 %v511_v17, %v192_v24 }
  0xdb   :  { %v478_v20 = vpop.f32.mrf.mxu0 }
  0xdc   :  { %v479_v16 = vadd.f32 %v478_v20, %v127_v9  ;;  %v567_v34 = vmax.f32 %v512_v26, 0.0 }
  0xde   :  { %v554_v29 = vmax.f32 %v479_v16, 0.0 }
  0xe0   :  { %v1725_v38 = vpack.c.bf16 %v554_v29, %v553_v22 }
  0xe1   :  { %v513_v28 = vpop.f32.mrf.mxu3 }
  0xe2   :  { %v514_v31 = vadd.f32 %v513_v28, %v197_v27 }
  0xe3   :  { %v481_v33 = vpop.f32.mrf.mxu0 }
  0xe4   :  { %v568_v36 = vmax.f32 %v514_v31, 0.0  ;;  %v482_v44 = vadd.f32 %v481_v33, %v132_v61 }
  0xe6   :  { %v1727_v39 = vpack.c.bf16 %v568_v36, %v567_v34  ;;  %v555_v56 = vmax.f32 %v482_v44, 0.0 }
  0xe9   :  { %v516_v40 = vpop.f32.mrf.mxu3 }
  0xea   :  { %v517_v46 = vadd.f32 %v516_v40, %v202_v7 }
  0xeb   :  { %v483_v41 = vpop.f32.mrf.mxu0 }
  0xec   :  { %v484_v45 = vadd.f32 %v483_v41, %v137_v0  ;;  %v569_v63 = vmax.f32 %v517_v46, 0.0 }
  0xee   :  { %v556_v58 = vmax.f32 %v484_v45, 0.0 }
  0xf0   :  { %v601_v2 = vpack.c.bf16 %v556_v58, %v555_v56 }
  0xf1   :  { %v518_v50 = vpop.f32.mrf.mxu3 }
  0xf2   :  { %v519_v60 = vadd.f32 %v518_v50, %v207_v13 }
  0xf3   :  { %v486_v62 = vpop.f32.mrf.mxu0 }
  0xf4   :  { %v570_v1 = vmax.f32 %v519_v60, 0.0 }
  0xf6   :  { %v1729_v3 = vpack.c.bf16 %v570_v1, %v569_v63 }
  0xf9   :  { %v521_v4 = vpop.f32.mrf.mxu3 }
  0xfa   :  { %v522_v6 = vadd.f32 %v521_v4, %v212_v57 }
  0xfb   :  { %v488_v5 = vpop.f32.mrf.mxu0 }
  0xfc   :  { %v571_v14 = vmax.f32 %v522_v6, 0.0  ;;  %v489_v50 = vadd.f32 %v488_v5, %v1713_v55  ;;  %v1284_v55 = vld [vmem:[%s1890_s2 + $0x4] sm:$0xf0] }
  0xfe   :  { %v558_v58 = vmax.f32 %v489_v50, 0.0  ;;  %v1291_v50 = vld [vmem:[%s1890_s2 + $0x44] sm:$0xf] }
 0x101   :  { %v523_v8 = vpop.f32.mrf.mxu3 }
 0x102   :  { %v524_v11 = vadd.f32 %v523_v8, %v217_v59 }
 0x103   :  { %v491_v12 = vpop.f32.mrf.mxu0 }
 0x104   :  { %v572_v61 = vmax.f32 %v524_v11, 0.0  ;;  %v492_v40 = vadd.f32 %v491_v12, %v1699_v49 }
 0x106   :  { %v1731_v0 = vpack.c.bf16 %v572_v61, %v571_v14 }
 0x109   :  { %v526_v7 = vpop.f32.mrf.mxu3 }
 0x10a   :  { %v527_v13 = vadd.f32 %v526_v7, %v1707_v52 }
 0x10b   :  { %v493_v19 = vpop.f32.mrf.mxu0 }
 0x10c   :  { %v573_v21 = vmax.f32 %v527_v13, 0.0 }
 0x111   :  { %v528_v17 = vpop.f32.mrf.mxu3 }
 0x112   :  { %v529_v20 = vadd.f32 %v528_v17, %v1709_v53 }
 0x113   :  { %v496_v9 = vpop.f32.mrf.mxu0 }
 0x114   :  { %v574_v16 = vmax.f32 %v529_v20, 0.0  ;;  %v497_v52 = vadd.f32 %v496_v9, %v1683_v42  ;;  %v559_v42 = vmax.f32 %v492_v40, 0.0 }
 0x116   :  { %v1735_v24 = vpack.c.bf16 %v574_v16, %v573_v21  ;;  %v561_v41 = vmax.f32 %v497_v52, 0.0  ;;  %v1287_v52 = vld [vmem:[%s1890_s2 + $0x24] sm:$0xf] }
 0x119   :  { %v531_v57 = vpop.f32.mrf.mxu3 }
 0x11a   :  { %v1738_v59 = vadd.f32 %v531_v57, %v1695_v47  ;;  %v494_v47 = vadd.f32 %v493_v19, %v1704_v51  ;;  %v1283_v57 = vld [vmem:[%s1890_s2 + $0x4] sm:$0xf] }
 0x11b   :  { %v498_v26 = vpop.f32.mrf.mxu0 }
 0x11c   :  { %v499_v53 = vadd.f32 %v498_v26, %v1685_v43  ;;  %v560_v56 = vmax.f32 %v494_v47, 0.0  ;;  %v575_v9 = vmax.f32 %v1738_v59, 0.0  ;;  %v1198_v59 = vld [vmem:[%s1890_s2 + $0x8] sm:$0xf0]  ;;  %v1289_v47 = vld [vmem:[%s1890_s2 + $0x34] sm:$0xf] }
 0x11d   :  { %v1201_v26 = vor.u32 %v1283_v57, %v1198_v59 }
 0x11e   :  { %v562_v44 = vmax.f32 %v499_v53, 0.0  ;;  %v603_v60 = vpack.c.bf16 %v560_v56, %v559_v42  ;;  %v1214_v53 = vld [vmem:[%s1890_s2 + $0x28] sm:$0xf0] }
 0x11f   :  { %v1230_v42 = vld [vmem:[%s1890_s2 + $0x48] sm:$0xf0] }
 0x120   :  { %v604_v43 = vpack.c.bf16 %v562_v44, %v561_v41  ;;  %v1222_v41 = vld [vmem:[%s1890_s2 + $0x38] sm:$0xf0]  ;;  %v1233_v56 = vor.u32 %v1291_v50, %v1230_v42 }
 0x121   :  { %v533_v27 = vpop.f32.mrf.mxu3  ;;  %v1225_v44 = vor.u32 %v1289_v47, %v1222_v41 }
 0x123   :  { %v501_v28 = vpop.f32.mrf.mxu0 }
 0x124   :  { %v502_v29 = vadd.f32 %v501_v28, %v1651_v30  ;;  %v487_v30 = vadd.f32 %v486_v62, %v1711_v54  ;;  %v1196_v54 = vld [vmem:[%s1890_s2] sm:$0xf]  ;;  %v1206_v28 = vld [vmem:[%s1890_s2 + $0x18] sm:$0xf0] }
 0x125   :  { %v1197_v1 = vor.u32 %v1284_v55, %v1196_v54  ;;  %v1246_v54 = vld [vmem:[%s1890_s2 + $0x68] sm:$0xf0] }
 0x126   :  { %v563_v34 = vmax.f32 %v502_v29, 0.0  ;;  %v1292_v29 = vld [vmem:[%s1890_s2 + $0x44] sm:$0xf0] }
 0x129   :  { %v536_v22 = vpop.f32.mrf.mxu3 }
 0x12b   :  { %v503_v31 = vpop.f32.mrf.mxu0 }
 0x12c   :  { %v504_v33 = vadd.f32 %v503_v31, %v1656_v32  ;;  %v557_v32 = vmax.f32 %v487_v30, 0.0 }
 0x12e   :  { %v564_v36 = vmax.f32 %v504_v33, 0.0  ;;  %v602_v49 = vpack.c.bf16 %v558_v58, %v557_v32  ;;  %v1217_v33 = vor.u32 %v1287_v52, %v1214_v53  ;;  %v1298_v32 = vld [vmem:[%s1890_s2 + $0x74] sm:$0xf0] }
 0x130   :  { %v605_v45 = vpack.c.bf16 %v564_v36, %v563_v34  ;;  %v1236_v34 = vld [vmem:[%s1890_s2 + $0x50] sm:$0xf]  ;;  %v1294_v36 = vld [vmem:[%s1890_s2 + $0x54] sm:$0xf0] }
 0x131   :  { %v538_v46 = vpop.f32.mrf.mxu3  ;;  %v1237_v40 = vor.u32 %v1294_v36, %v1236_v34 }
 0x132   :  { %792 = vmatpush.bf16.msra.mxu1 %v605_v45  ;;  %v539_v12 = vadd.f32 %v538_v46, %v1669_v37  ;;  %v1244_v45 = vld [vmem:[%s1890_s2 + $0x60] sm:$0xf]  ;;  %v1296_v46 = vld [vmem:[%s1890_s2 + $0x64] sm:$0xf0] }
 0x133   :  { %v1245_v30 = vor.u32 %v1296_v46, %v1244_v45 }
 0x134   :  { %v578_v19 = vmax.f32 %v539_v12, 0.0 }
 0x136   :  { %793 = vmatpush.bf16.msra.mxu1 %v604_v43  ;;  %v1252_v43 = vld [vmem:[%s1890_s2 + $0x70] sm:$0xf] }
 0x137   :  { %v1253_v58 = vor.u32 %v1298_v32, %v1252_v43 }
 0x139   :  { %v541_v63 = vpop.f32.mrf.mxu3 }
 0x13a   :  { %794 = vmatpush.bf16.msra.mxu1 %v603_v60  ;;  %v542_v6 = vadd.f32 %v541_v63, %v1630_v23  ;;  %v534_v23 = vadd.f32 %v533_v27, %v1697_v48  ;;  %v1288_v48 = vld [vmem:[%s1890_s2 + $0x24] sm:$0xf0]  ;;  %v1285_v27 = vld [vmem:[%s1890_s2 + $0x14] sm:$0xf]  ;;  %v1238_v63 = vld [vmem:[%s1890_s2 + $0x58] sm:$0xf0] }
 0x13b   :  { %v1293_v60 = vld [vmem:[%s1890_s2 + $0x54] sm:$0xf] }
 0x13c   :  { %v579_v7 = vmax.f32 %v542_v6, 0.0  ;;  %v576_v17 = vmax.f32 %v534_v23, 0.0  ;;  %v1254_v6 = vld [vmem:[%s1890_s2 + $0x78] sm:$0xf0] }
 0x13e   :  { %795 = vmatpush.bf16.msra.mxu1 %v602_v49  ;;  %v611_v21 = vpack.c.bf16 %v576_v17, %v575_v9  ;;  %v1241_v49 = vor.u32 %v1293_v60, %v1238_v63 }
 0x141   :  { %v543_v51 = vpop.f32.mrf.mxu3 }
 0x142   :  { %796 = vmatpush.bf16.msra.mxu1 %v601_v2  ;;  %v544_v2 = vadd.f32 %v543_v51, %v1635_v25  ;;  %v537_v25 = vadd.f32 %v536_v22, %v1664_v35  ;;  %v1212_v35 = vld [vmem:[%s1890_s2 + $0x20] sm:$0xf]  ;;  %v1295_v51 = vld [vmem:[%s1890_s2 + $0x64] sm:$0xf] }
 0x143   :  { %v1213_v16 = vor.u32 %v1288_v48, %v1212_v35  ;;  %v1228_v22 = vld [vmem:[%s1890_s2 + $0x40] sm:$0xf]  ;;  %v1249_v55 = vor.u32 %v1295_v51, %v1246_v54 }
 0x144   :  { %v580_v14 = vmax.f32 %v544_v2, 0.0  ;;  %v577_v37 = vmax.f32 %v537_v25, 0.0  ;;  %v1229_v31 = vor.u32 %v1292_v29, %v1228_v22 }
 0x146   :  { %797 = vmatpush.bf16.msra.mxu1 %v1725_v38  ;;  %v613_v13 = vpack.c.bf16 %v580_v14, %v579_v7  ;;  %v612_v20 = vpack.c.bf16 %v578_v19, %v577_v37 }
 0x149   :  { %v546_v62 = vpop.f32.mrf.mxu3 }
 0x14a   :  { %798 = vmatpush.bf16.msra.mxu1 %v1723_v15  ;;  %v547_v4 = vadd.f32 %v546_v62, %v1594_v10  ;;  %v1204_v15 = vld [vmem:[%s1890_s2 + $0x10] sm:$0xf]  ;;  %v1286_v10 = vld [vmem:[%s1890_s2 + $0x14] sm:$0xf0]  ;;  %v634_v62 = vpop.permute.xlu2 %633 }
 0x14c   :  { %v581_v8 = vmax.f32 %v547_v4, 0.0  ;;  %v639_v4 = vpop.permute.xlu0 %638 }
 0x14d   :  { %799 = vmatmul.bf16.vlgmr.msra.gmra.mxu1 %v1197_v1 }
 0x151   :  { %v548_v5 = vpop.f32.mrf.mxu3 }
 0x152   :  { %v549_v38 = vadd.f32 %v548_v5, %v1617_v18  ;;  %v1205_v18 = vor.u32 %v1286_v10, %v1204_v15  ;;  %v644_v5 = vpop.permute.xlu1 %643  ;;  %v649_v2 = vpop.permute.xlu2 %648 }
 0x154   :  { %v582_v11 = vmax.f32 %v549_v38, 0.0  ;;  %v1297_v38 = vld [vmem:[%s1890_s2 + $0x74] sm:$0xf]  ;;  %v654_v12 = vpop.permute.xlu0 %653 }
 0x156   :  { %v614_v61 = vpack.c.bf16 %v582_v11, %v581_v8  ;;  %v1257_v11 = vor.u32 %v1297_v38, %v1254_v6 }
 0x158   :  { %840 = vmatpush.bf16.msra.mxu2 %v614_v61 }
 0x15a   :  { %v1858_v14 = vpop.permute.xlu1 %658  ;;  %v1860_v61 = vpop.permute.xlu2 %663 }
 0x15c   :  { %841 = vmatpush.bf16.msra.mxu2 %v613_v13  ;;  %v1862_v10 = vpop.permute.xlu0 %668 }
 0x15d   :  { %804 = vmatmul.bf16.gmra.mxu1 %v1205_v18 }
 0x160   :  { %842 = vmatpush.bf16.msra.mxu2 %v612_v20 }
 0x162   :  { %v1864_v25 = vpop.permute.xlu1 %673  ;;  %v1866_v7 = vpop.permute.xlu2 %678 }
 0x164   :  { %843 = vmatpush.bf16.msra.mxu2 %v611_v21  ;;  %v1868_v19 = vpop.permute.xlu0 %683 }
 0x168   :  { %844 = vmatpush.bf16.msra.mxu2 %v1735_v24  ;;  %v1220_v24 = vld [vmem:[%s1890_s2 + $0x30] sm:$0xf] }
 0x16a   :  { %v1870_v17 = vpop.permute.xlu1 %688  ;;  %v1872_v20 = vpop.permute.xlu2 %693 }
 0x16c   :  { %845 = vmatpush.bf16.msra.mxu2 %v1731_v0  ;;  %v1290_v0 = vld [vmem:[%s1890_s2 + $0x34] sm:$0xf0]  ;;  %v1874_v57 = vpop.permute.xlu0 %698  ;;  %s1343_s2 = smov [#allocation3]  }
 0x16d   :  { %809 = vmatmul.bf16.gmra.mxu1 %v1213_v16  ;;  %s1071_s28 = sshll.u32 %s1343_s2, 4  ;;  %s1072_s28 = int_to_ptr.vmem [resolvable:$true] %s1071_s28 }
 0x170   :  { %846 = vmatpush.bf16.msra.mxu2 %v1729_v3  ;;  %v1221_v3 = vor.u32 %v1290_v0, %v1220_v24 }
 0x172   :  { %v929_v24 = vpop.permute.xlu2 %928 }
 0x174   :  { %847 = vmatpush.bf16.msra.mxu2 %v1727_v39  ;;  %v1209_v39 = vor.u32 %v1285_v27, %v1206_v28  ;;  %v934_v52 = vpop.permute.xlu0 %933 }
 0x177   :  { %848 = vmatmul.bf16.vlgmr.msra.gmra.mxu2 %v1201_v26  ;;  %v924_v26 = vpop.permute.xlu1 %923 }
 0x17a   :  { %v944_v43 = vpop.permute.xlu2 %943 }
 0x17c   :  { %v949_v38 = vpop.permute.xlu0 %948 }
 0x17d   :  { %814 = vmatmul.bf16.gmra.mxu1 %v1221_v3 }
 0x187   :  { %853 = vmatmul.bf16.gmra.mxu2 %v1209_v39 }
 0x18d   :  { %819 = vmatmul.bf16.gmra.mxu1 %v1229_v31 }
 0x197   :  { %858 = vmatmul.bf16.gmra.mxu2 %v1217_v33 }
 0x19d   :  { %824 = vmatmul.bf16.gmra.mxu1 %v1237_v40 }
 0x1a7   :  { %863 = vmatmul.bf16.gmra.mxu2 %v1225_v44  ;;  %v939_v44 = vpop.permute.xlu1 %938 }
 0x1ad   :  { %829 = vmatmul.bf16.gmra.mxu1 %v1245_v30 }
 0x1b7   :  { %868 = vmatmul.bf16.gmra.mxu2 %v1233_v56 }
 0x1bd   :  { %834 = vmatmul.bf16.gmra.mxu1 %v1253_v58 }
 0x1c7   :  { %873 = vmatmul.bf16.gmra.mxu2 %v1241_v49 }
 0x1ca   :  { %v800_v1 = vpop.f32.mrf.mxu1 }
 0x1cb   :  { %v801_v23 = vadd.f32 %v800_v1, %v634_v62 }
 0x1d2   :  { %v802_v8 = vpop.f32.mrf.mxu1 }
 0x1d3   :  { %v803_v21 = vadd.f32 %v802_v8, %v639_v4  ;;  %v954_v8 = vpop.permute.xlu1 %953 }
 0x1d7   :  { %878 = vmatmul.bf16.gmra.mxu2 %v1249_v55 }
 0x1da   :  { %v805_v15 = vpop.f32.mrf.mxu1 }
 0x1db   :  { %v806_v27 = vadd.f32 %v805_v15, %v644_v5 }
 0x1e2   :  { %v807_v18 = vpop.f32.mrf.mxu1 }
 0x1e3   :  { %v808_v33 = vadd.f32 %v807_v18, %v649_v2  ;;  %v964_v18 = vpop.permute.xlu0 %963 }
 0x1e7   :  { %883 = vmatmul.bf16.gmra.mxu2 %v1257_v11 }
 0x1ea   :  { %v810_v9 = vpop.f32.mrf.mxu1 }
 0x1eb   :  { %v811_v46 = vadd.f32 %v810_v9, %v654_v12  ;;  %v959_v12 = vpop.permute.xlu2 %958 }
 0x1f2   :  { %v812_v39 = vpop.f32.mrf.mxu1 }
 0x1f3   :  { %v813_v15 = vadd.f32 %v812_v39, %v1858_v14 }
 0x1fa   :  { %v849_v13 = vpop.f32.mrf.mxu2  ;;  %v815_v47 = vpop.f32.mrf.mxu1 }
 0x1fb   :  { %v850_v37 = vadd.f32 %v849_v13, %v801_v23  ;;  %v816_v23 = vadd.f32 %v815_v47, %v1860_v61 }
 0x1fd   :  { %v889_v48 = vmax.f32 %v850_v37, 0.0 }
 0x1ff   :  { %v1001_v0 = vmul.f32 %v924_v26, %v889_v48  ;;  %v969_v48 = vpop.permute.xlu1 %968 }
 0x202   :  { %v851_v35 = vpop.f32.mrf.mxu2  ;;  %v817_v32 = vpop.f32.mrf.mxu1 }
 0x203   :  { %v852_v16 = vadd.f32 %v851_v35, %v803_v21  ;;  %v818_v37 = vadd.f32 %v817_v32, %v1862_v10 }
 0x205   :  { %v890_v59 = vmax.f32 %v852_v16, 0.0 }
 0x207   :  { %v1002_v3 = vmul.f32 %v929_v24, %v890_v59  ;;  %v974_v24 = vpop.permute.xlu2 %973  ;;  %v979_v47 = vpop.permute.xlu1 %978 }
 0x209   :  { %v1017_v28 = vadd.f32 %v1002_v3, %v1001_v0 }
 0x20a   :  { %v854_v22 = vpop.f32.mrf.mxu2  ;;  %v820_v49 = vpop.f32.mrf.mxu1 }
 0x20b   :  { %v855_v29 = vadd.f32 %v854_v22, %v806_v27  ;;  %v821_v26 = vadd.f32 %v820_v49, %v1864_v25  ;;  %v704_v22 = vpop.permute.xlu0 %703 }
 0x20d   :  { %v891_v31 = vmax.f32 %v855_v29, 0.0 }
 0x20f   :  { %v1003_v53 = vmul.f32 %v934_v52, %v891_v31 }
 0x211   :  { %v1018_v34 = vadd.f32 %v1017_v28, %v1003_v53 }
 0x212   :  { %v856_v36 = vpop.f32.mrf.mxu2  ;;  %v822_v54 = vpop.f32.mrf.mxu1 }
 0x213   :  { %v857_v40 = vadd.f32 %v856_v36, %v808_v33  ;;  %v823_v3 = vadd.f32 %v822_v54, %v1866_v7  ;;  %v984_v49 = vpop.permute.xlu0 %983 }
 0x215   :  { %v892_v41 = vmax.f32 %v857_v40, 0.0 }
 0x217   :  { %v1004_v45 = vmul.f32 %v939_v44, %v892_v41 }
 0x219   :  { %v1019_v30 = vadd.f32 %v1018_v34, %v1004_v45 }
 0x21a   :  { %v859_v50 = vpop.f32.mrf.mxu2  ;;  %v825_v1 = vpop.f32.mrf.mxu1 }
 0x21b   :  { %v860_v42 = vadd.f32 %v859_v50, %v811_v46  ;;  %v826_v61 = vadd.f32 %v825_v1, %v1868_v19 }
 0x21d   :  { %v893_v56 = vmax.f32 %v860_v42, 0.0 }
 0x21f   :  { %v1005_v58 = vmul.f32 %v944_v43, %v893_v56 }
 0x221   :  { %v1020_v60 = vadd.f32 %v1019_v30, %v1005_v58  ;;  %v709_v30 = vpop.permute.xlu2 %708 }
 0x222   :  { %v861_v63 = vpop.f32.mrf.mxu2  ;;  %v827_v5 = vpop.f32.mrf.mxu1 }
 0x223   :  { %v862_v13 = vadd.f32 %v861_v63, %v813_v15  ;;  %v828_v31 = vadd.f32 %v827_v5, %v1870_v17  ;;  %v989_v5 = vpop.permute.xlu1 %988 }
 0x225   :  { %v894_v16 = vmax.f32 %v862_v13, 0.0 }
 0x227   :  { %v1006_v14 = vmul.f32 %v949_v38, %v894_v16 }
 0x229   :  { %v1021_v33 = vadd.f32 %v1020_v60, %v1006_v14 }
 0x22a   :  { %v864_v51 = vpop.f32.mrf.mxu2  ;;  %v830_v6 = vpop.f32.mrf.mxu1 }
 0x22b   :  { %v865_v9 = vadd.f32 %v864_v51, %v816_v23  ;;  %v831_v36 = vadd.f32 %v830_v6, %v1872_v20 }
 0x22d   :  { %v895_v0 = vmax.f32 %v865_v9, 0.0 }
 0x22f   :  { %v1007_v10 = vmul.f32 %v954_v8, %v895_v0  ;;  %v994_v8 = vpop.permute.xlu2 %993 }
 0x231   :  { %v1022_v41 = vadd.f32 %v1021_v33, %v1007_v10 }
 0x232   :  { %v866_v55 = vpop.f32.mrf.mxu2  ;;  %v832_v21 = vpop.f32.mrf.mxu1 }
 0x233   :  { %v867_v59 = vadd.f32 %v866_v55, %v818_v37  ;;  %v833_v44 = vadd.f32 %v832_v21, %v1874_v57  ;;  %v999_v37 = vpop.permute.xlu0 %998 }
 0x235   :  { %v896_v28 = vmax.f32 %v867_v59, 0.0 }
 0x237   :  { %v1008_v34 = vmul.f32 %v959_v12, %v896_v28 }
 0x239   :  { %v1023_v50 = vadd.f32 %v1022_v41, %v1008_v34 }
 0x23a   :  { %v869_v62 = vpop.f32.mrf.mxu2  ;;  %v835_v25 = vpop.f32.mrf.mxu1 }
 0x23b   :  { %v870_v27 = vadd.f32 %v869_v62, %v821_v26  ;;  %v836_v42 = vadd.f32 %v835_v25, %v704_v22 }
 0x23d   :  { %v897_v52 = vmax.f32 %v870_v27, 0.0 }
 0x23f   :  { %v1009_v19 = vmul.f32 %v964_v18, %v897_v52 }
 0x241   :  { %v1024_v58 = vadd.f32 %v1023_v50, %v1009_v19 }
 0x242   :  { %v871_v4 = vpop.f32.mrf.mxu2  ;;  %v837_v62 = vpop.f32.mrf.mxu1 }
 0x243   :  { %v872_v39 = vadd.f32 %v871_v4, %v823_v3 }
 0x245   :  { %v898_v40 = vmax.f32 %v872_v39, 0.0 }
 0x247   :  { %v1010_v17 = vmul.f32 %v969_v48, %v898_v40 }
 0x249   :  { %v1025_v51 = vadd.f32 %v1024_v58, %v1010_v17 }
 0x24a   :  { %v874_v2 = vpop.f32.mrf.mxu2 }
 0x24b   :  { %v875_v53 = vadd.f32 %v874_v2, %v826_v61  ;;  %v838_v2 = vadd.f32 %v837_v62, %v709_v30 }
 0x24d   :  { %v899_v45 = vmax.f32 %v875_v53, 0.0 }
 0x24f   :  { %v1011_v60 = vmul.f32 %v974_v24, %v899_v45  ;;  %v1042_v24 = vpop.permute.xlu1 %1041 }
 0x250   :  { %v1044_v3 = vperm.slane %v1042_v24, 0 }
 0x251   :  { %v1026_v57 = vadd.f32 %v1025_v51, %v1011_v60 }
 0x252   :  { %v876_v11 = vpop.f32.mrf.mxu2 }
 0x253   :  { %v877_v7 = vadd.f32 %v876_v11, %v828_v31 }
 0x255   :  { %v900_v56 = vmax.f32 %v877_v7, 0.0 }
 0x257   :  { %v1012_v54 = vmul.f32 %v979_v47, %v900_v56 }
 0x259   :  { %v1027_v38 = vadd.f32 %v1026_v57, %v1012_v54 }
 0x25a   :  { %v879_v35 = vpop.f32.mrf.mxu2 }
 0x25b   :  { %v880_v46 = vadd.f32 %v879_v35, %v831_v36 }
 0x25d   :  { %v901_v63 = vmax.f32 %v880_v46, 0.0 }
 0x25f   :  { %v1013_v1 = vmul.f32 %v984_v49, %v901_v63 }
 0x261   :  { %v1028_v12 = vadd.f32 %v1027_v38, %v1013_v1 }
 0x262   :  { %v881_v29 = vpop.f32.mrf.mxu2 }
 0x263   :  { %v882_v43 = vadd.f32 %v881_v29, %v833_v44 }
 0x265   :  { %v902_v55 = vmax.f32 %v882_v43, 0.0 }
 0x267   :  { %v1014_v6 = vmul.f32 %v989_v5, %v902_v55 }
 0x269   :  { %v1029_v23 = vadd.f32 %v1028_v12, %v1014_v6 }
 0x26a   :  { %v884_v32 = vpop.f32.mrf.mxu2 }
 0x26b   :  { %v885_v20 = vadd.f32 %v884_v32, %v836_v42 }
 0x26d   :  { %v903_v4 = vmax.f32 %v885_v20, 0.0 }
 0x26f   :  { %v1015_v15 = vmul.f32 %v994_v8, %v903_v4 }
 0x271   :  { %v1030_v9 = vadd.f32 %v1029_v23, %v1015_v15 }
 0x272   :  { %v886_v11 = vpop.f32.mrf.mxu2 }
 0x273   :  { %v887_v18 = vadd.f32 %v886_v11, %v838_v2 }
 0x275   :  { %v904_v13 = vmax.f32 %v887_v18, 0.0 }
 0x277   :  { %v1016_v21 = vmul.f32 %v999_v37, %v904_v13 }
 0x279   :  { %v1031_v35 = vadd.f32 %v1030_v9, %v1016_v21 }
 0x27b   :  { %v1032_v48 = vrot.slane %v1031_v35, 4 }
 0x27d   :  { %v1033_v16 = vadd.f32 %v1032_v48, %v1031_v35 }
 0x27f   :  { %v1034_v59 = vrot.slane %v1033_v16, 2 }
 0x281   :  { %v1035_v26 = vadd.f32 %v1034_v59, %v1033_v16 }
 0x283   :  { %v1036_v0 = vrot.slane %v1035_v26, 1 }
 0x285   :  { %v1037_v27 = vadd.f32 %v1036_v0, %v1035_v26 }
 0x287   :  { %v1045_v14 = vadd.f32 %v1044_v3, %v1037_v27 }
 0x289   :  { %v1258_v28 = vmul.f32 -1.442695, %v1045_v14 }
 0x28b   :  { %1312 = vpow2.f32 %v1258_v28 }
 0x291   :  { %v1313_v61 = vpop.eup %1312 }
 0x292   :  { %v1049_v39 = vadd.f32 1.0, %v1313_v61 }
 0x294   :  { %1314 = vrcp.f32 %v1049_v39  ;;  %v1061_v31 = vand.u32 2147483648, %v1049_v39  ;;  %v1059_v53 = vand.u32 2147483647, %v1049_v39  ;;  %vm1055_vm2 = vweird.f32 %v1049_v39 }
 0x296   :  { %v1062_v34 = vor.u32 1.1754944e-38, %v1061_v31  ;;  %vm1060_vm4 = vcmp.eq.f32.partialorder %v1059_v53, 8.507059e+37 }
 0x29a   :  { %v1315_v22 = vpop.eup %1314 }
 0x29b   :  { %v1051_v10 = vmul.f32 %v1315_v22, %v1049_v39  ;;  %vm1056_vm1 = vweird.f32 %v1315_v22 }
 0x29c   :  { %vm1057_vm3 = vmor %vm1055_vm2, %vm1056_vm1 }
 0x29d   :  { %v1052_v29 = vsub.f32 1.0, %v1051_v10 }
 0x29f   :  { %v1053_v52 = vmul.f32 %v1315_v22, %v1052_v29 }
 0x2a1   :  { %v1054_v33 = vadd.f32 %v1315_v22, %v1053_v52 }
 0x2a3   :  { %v1058_v25 = vsel %vm1057_vm3, %v1315_v22, %v1054_v33 }
 0x2a4   :  { %v1063_v36 = vsel %vm1060_vm4, %v1062_v34, %v1058_v25 }
 0x2a5   :  { %1065 = vst [vmem:[#allocation3] sm:$0x1] %v1063_v36 }
 0x2a6   :  { %1076 = dma.vmem_to_hbm [thread:$0]  %s1072_s28, 16, %s1074_s8, [#allocation4]  }
 0x2a7   :  { %1340 = dma.done.wait [#allocation4], 16  }
 0x2a8   :  { %1341 = vsyncadd [#allocation4], 4294967280 }
 0x2a9   :  { %1081 = vsyncpa [#allocation4], 1 }

</bundles_post_ra>
